<compile_context>
chip_gen: v7x
topology: tpu7x:2x2x1
jax: 0.10.0
libtpu: 0.0.40
codegen_flags: <defaults>
</compile_context>

<pallas_src>
import functools

import jax
import jax.numpy as jnp
from jax.experimental import pallas as pl
from jax.experimental.pallas import tpu as pltpu


def _residual_block_kernel(x_ref, w_ref, p_ref, out_ref, *, K, P, T, FC, matmul_dtype):
    """One grid step = one folded group of F batch elements.

    x_ref  : (FC, T)        FC = F*Cin folded rows (row = f*Cin + c), time on lanes.
    w_ref  : (2*FC, K*FC)   block-diagonal im2col conv weight;
                            rows [0, FC) = GLU value half, rows [FC, 2*FC) = gate half.
    p_ref  : (4*FC, 1)      packed AdaIN params [1+gamma_v; 1+gamma_g; beta_v; beta_g].
    out_ref: (FC, T)        x + GLU(AdaIN(conv(x))), same folded row ordering as x.
    """
    x = x_ref[...]                                            # (FC, T) keep for residual
    xm = x if matmul_dtype is None else x.astype(matmul_dtype)

    # im2col stack built from XLU rolls + one lane mask (no zero buffers,
    # no unaligned lane concats). Row block k of xstk is x shifted by (k - P).
    lane = jax.lax.broadcasted_iota(jnp.int32, (FC, T), 1)
    cols = []
    for k in range(K):
        s = k - P                                             # shifted[:, t] = x[:, t + s]
        if s == 0:
            cols.append(xm)
        else:
            rolled = pltpu.roll(xm, shift=(-s) % T, axis=1)   # rolled[:, t] = x[:, (t+s) % T]
            valid = jnp.logical_and(lane + s >= 0, lane + s < T)
            cols.append(jnp.where(valid, rolled, jnp.zeros_like(rolled)))
    xstk = cols[0] if K == 1 else jnp.concatenate(cols, axis=0)   # (K*FC, T), 8-aligned concat

    # Conv1d for all folded batches and both GLU halves in ONE MXU matmul.
    y = jnp.dot(w_ref[...], xstk, preferred_element_type=jnp.float32)   # (2*FC, T) f32

    p = p_ref[...]                                            # (4*FC, 1)
    g1 = p[: 2 * FC]                                          # 1 + gamma (value rows, gate rows)
    beta = p[2 * FC:]                                         # beta      (value rows, gate rows)

    # AdaIN over time; (1+gamma) * rsqrt(var + eps) folded into one scale (EUP).
    u = jnp.mean(y, axis=-1, keepdims=True)                   # (2*FC, 1)
    d = y - u
    var = jnp.mean(d * d, axis=-1, keepdims=True)
    ad = d * (g1 * jax.lax.rsqrt(var + 1e-8)) + beta          # (2*FC, T)

    # GLU (value * sigmoid(gate)) + residual; value-row ordering == x row ordering.
    out_ref[...] = (x + ad[:FC] * jax.nn.sigmoid(ad[FC:])).astype(out_ref.dtype)


def _blockdiag_im2col(w_half, F):
    """w_half: (chalf, Cin, K) -> (F*chalf, K*F*Cin) block-diagonal im2col weight.

    Row index   = f*chalf + o           (matches the folded batch/channel rows)
    Column index= k*(F*Cin) + g*Cin + c (matches concat-over-k of folded shifts)
    Entry       = delta(f, g) * w_half[o, c, k]
    """
    chalf, Cin, K = w_half.shape
    eye = jnp.eye(F, dtype=w_half.dtype)
    big = jnp.einsum("fg,ock->fokgc", eye, w_half)            # (F, chalf, K, F, Cin)
    return big.reshape(F * chalf, K * F * Cin)


def _vmem_capacity_bytes():
    try:
        return int(pltpu.get_tpu_info().vmem_capacity_bytes)
    except Exception:
        return 64 * 1024 * 1024           # v7x-safe fallback


def _num_tensorcores():
    try:
        n = getattr(jax.devices()[0], "num_cores", None)
        if n:
            return int(n)
    except Exception:
        pass
    return 1


def _fold_footprint_bytes(F, Cin, T, K, mm_bytes):
    fc = F * Cin
    io = 2 * (2 * fc * T * 4)                 # double-buffered x / out blocks (f32)
    w = 2 * (2 * fc) * (K * fc) * mm_bytes    # block-diag weight (double-buffer worst case)
    stk = K * fc * T * mm_bytes               # im2col stack
    tmp = 3 * (2 * fc) * T * 4                # y / d / ad f32 temporaries
    return io + w + stk + tmp


def _pick_fold(B, Cin, T, K, mm_bytes, num_cores, vmem_budget):
    """Fold factor F = batch elements folded into sublanes per grid step."""
    def valid(F):
        return B % F == 0 and ((F * Cin) % 8 == 0 or F == B)

    cands = [F for F in range(1, B + 1) if valid(F)]
    if Cin % 8 == 0:
        # Sublanes already full at F=1: folding would only add block-diagonal
        # (zero-padded) MXU work, so keep one batch group per step.
        cands = [1]
    good = [F for F in cands if _fold_footprint_bytes(F, Cin, T, K, mm_bytes) <= vmem_budget]
    if not good:
        good = [min(cands)]
    # Prefer a grid that splits evenly across TensorCores (v7x megacore);
    # on single-TC chips (v5e/v6e) this keeps the largest fold / fewest steps.
    balanced = [F for F in good if (B // F) % max(1, num_cores) == 0]
    return max(balanced or good)


def residual_block(x, c, w_conv, b_conv, w_fc, b_fc, *, padding,
                   fold=None, matmul_dtype=None):
    """x: (B, Cin, T) float32 (PyTorch NCL); c: (B, S). Returns (B, Cin, T).

    matmul_dtype: optionally jnp.bfloat16 to feed the MXU bf16 inputs (f32
    accumulation) — supported on v5e/v6e/v7x; validate tolerances first since
    AdaIN's rsqrt(var + eps) amplifies relative error at small variances.
    """
    B, Cin, T = x.shape
    Cout, Cin_w, K = w_conv.shape
    chalf = Cout // 2
    assert Cin_w == Cin and Cout == 2 * Cin, "GLU + residual require dim_out == 2*dim_in"
    assert 2 * padding == K - 1, "residual add requires 'same' conv (stride 1)"

    mm_bytes = 4 if matmul_dtype is None else jnp.dtype(matmul_dtype).itemsize
    vmem_cap = _vmem_capacity_bytes()
    vmem_limit = int(min(vmem_cap // 2, 100 * 1024 * 1024))
    if fold is not None:
        F = int(fold)
        assert B % F == 0 and ((F * Cin) % 8 == 0 or F == B), "invalid fold"
    else:
        F = _pick_fold(B, Cin, T, K, mm_bytes, _num_tensorcores(), int(vmem_limit * 0.7))
    G = B // F
    FC = F * Cin                              # folded rows per group (== F * chalf)

    # Block-diagonal im2col weight, GLU value rows first then gate rows.
    wbig = jnp.concatenate(
        [_blockdiag_im2col(w_conv[:chalf], F), _blockdiag_im2col(w_conv[chalf:], F)], axis=0)
    if matmul_dtype is not None:
        wbig = wbig.astype(matmul_dtype)

    # Conv bias dropped on purpose: AdaIN subtracts the per-(batch, channel)
    # mean over time inside this block, so a per-channel constant cancels
    # exactly (variance unchanged). Revisit if the block's stats axis changes.
    del b_conv

    # Style FC hoisted to one XLA matmul; pack the four tiny AdaIN vectors into
    # a single (G * 4*FC, 1) array -> one side-input DMA per grid step.
    h = (c @ w_fc.T + b_fc).astype(jnp.float32)               # (B, 2*Cout)
    gamma, beta = h[:, :Cout], h[:, Cout:]
    g1 = 1.0 + gamma
    params = jnp.concatenate(
        [g1[:, :chalf].reshape(G, FC), g1[:, chalf:].reshape(G, FC),
         beta[:, :chalf].reshape(G, FC), beta[:, chalf:].reshape(G, FC)],
        axis=1).reshape(G * 4 * FC, 1)

    # Free row-major reshape: fold batch into the channel/sublane axis.
    x2 = x.reshape(B * Cin, T)

    kernel = functools.partial(_residual_block_kernel, K=K, P=padding, T=T, FC=FC,
                               matmul_dtype=matmul_dtype)

    # NOTE: whole-T blocks (AdaIN needs full-time statistics). For very large T,
    # add a time-tile grid axis with two-pass / resident-accumulator stats.
    out = pl.pallas_call(
        kernel,
        out_shape=jax.ShapeDtypeStruct((B * Cin, T), x.dtype),
        grid_spec=pltpu.PrefetchScalarGridSpec(
            num_scalar_prefetch=0,
            grid=(G,),
            in_specs=[
                pl.BlockSpec((FC, T), lambda i: (i, 0)),            # folded x
                pl.BlockSpec((2 * FC, K * FC), lambda i: (0, 0)),   # block-diag im2col weight
                pl.BlockSpec((4 * FC, 1), lambda i: (i, 0)),        # packed 1+gamma / beta
            ],
            out_specs=pl.BlockSpec((FC, T), lambda i: (i, 0)),
        ),
        compiler_params=pltpu.CompilerParams(
            dimension_semantics=("parallel",),
            vmem_limit_bytes=vmem_limit,
        ),
    )(x2, wbig, params)
    return out.reshape(B, Cin, T)


def reference(x, c, w_conv, b_conv, w_fc, b_fc, *, padding):
    """Pure-JAX reference of the PyTorch forward pass (for verification)."""
    Cout = w_conv.shape[0]
    y = jax.lax.conv_general_dilated(
        x, w_conv, window_strides=(1,), padding=[(padding, padding)],
        dimension_numbers=("NCH", "OIH", "NCH")) + b_conv[None, :, None]
    h = c @ w_fc.T + b_fc                                     # (B, 2*Cout)
    gamma = h[:, :Cout][:, :, None]
    beta = h[:, Cout:][:, :, None]
    u = jnp.mean(y, axis=2, keepdims=True)
    var = jnp.mean((y - u) * (y - u), axis=2, keepdims=True)
    std = jnp.sqrt(var + 1e-8)
    ad = (1.0 + gamma) * (y - u) / std + beta
    glu = ad[:, :Cout // 2] * jax.nn.sigmoid(ad[:, Cout // 2:])
    return x + glu


if __name__ == "__main__":
    # Module hyper-params (stride must be 1 and padding=(k-1)/2 so the residual
    # add is shape-consistent; dim_out must be 2*dim_in for GLU + residual).
    dim_in, dim_out, kernel_size, stride, padding, style_num = 4, 8, 3, 1, 1, 8
    B, T = 4, 128   # T = 128 keeps the lane axis fully dense

    key = jax.random.PRNGKey(0)
    k_x, k_c, k_wc, k_bc, k_wf, k_bf = jax.random.split(key, 6)

    x = jax.random.normal(k_x, (B, dim_in, T), jnp.float32)
    c = jax.random.normal(k_c, (B, style_num), jnp.float32)
    w_conv = 0.1 * jax.random.normal(k_wc, (dim_out, dim_in, kernel_size), jnp.float32)
    b_conv = 0.1 * jax.random.normal(k_bc, (dim_out,), jnp.float32)
    w_fc = 0.1 * jax.random.normal(k_wf, (dim_out * 2, style_num), jnp.float32)
    b_fc = 0.1 * jax.random.normal(k_bf, (dim_out * 2,), jnp.float32)

    ref = reference(x, c, w_conv, b_conv, w_fc, b_fc, padding=padding)

    # Auto fold (single grid step on single-TC chips).
    out = residual_block(x, c, w_conv, b_conv, w_fc, b_fc, padding=padding)
    out = jax.block_until_ready(out)
    assert out.shape == (B, dim_in, T)
    assert jnp.allclose(out, ref, atol=1e-3, rtol=1e-3), "mismatch vs reference (auto fold)"

    # Explicit fold=2 -> 2 folded groups -> 2 grid steps (exercises the index maps).
    out2 = residual_block(x, c, w_conv, b_conv, w_fc, b_fc, padding=padding, fold=2)
    out2 = jax.block_until_ready(out2)
    assert jnp.allclose(out2, ref, atol=1e-3, rtol=1e-3), "mismatch vs reference (fold=2)"

    print("KERNEL_OK")
</pallas_src>

<mosaic_0001>
module attributes {stable_mosaic.version = 11 : i64} {
  func.func @_residual_block_kernel(%arg0: i32, %arg1: memref<16x128xf32, #tpu.memory_space<vmem>>, %arg2: memref<32x48xf32, #tpu.memory_space<vmem>>, %arg3: memref<64x1xf32, #tpu.memory_space<vmem>>, %arg4: memref<16x128xf32, #tpu.memory_space<vmem>>) attributes {dimension_semantics = [#tpu.dimension_semantics<parallel>], iteration_bounds = array<i64: 1>, scalar_prefetch = 0 : i64, scratch_operands = 0 : i64, tpu.core_type = #tpu.core_type<tc>, window_params = [{transform_indices = @transform_0, window_bounds = array<i64: 16, 128>}, {pipeline_mode = #tpu.pipeline_mode<synchronous>, transform_indices = @transform_1, window_bounds = array<i64: 32, 48>}, {transform_indices = @transform_2, window_bounds = array<i64: 64, 1>}, {transform_indices = @transform_3, window_bounds = array<i64: 16, 128>}]} {
    %c0 = arith.constant 0 : index
    %c0_0 = arith.constant 0 : index
    %0 = vector.load %arg1[%c0, %c0_0] : memref<16x128xf32, #tpu.memory_space<vmem>>, vector<16x128xf32>
    %1 = tpu.iota {dimensions = array<i32: 1>} : vector<16x128xi32>
    %c1_i32 = arith.constant 1 : i32
    %2 = tpu.dynamic_rotate %0 by %c1_i32 dim 1 : vector<16x128xf32>, i32 -> vector<16x128xf32>
    %c-1_i32 = arith.constant -1 : i32
    %3 = vector.broadcast %c-1_i32 : i32 to vector<16x128xi32>
    %4 = arith.addi %1, %3 : vector<16x128xi32>
    %c0_i32 = arith.constant 0 : i32
    %5 = vector.broadcast %c0_i32 : i32 to vector<16x128xi32>
    %6 = arith.cmpi sge, %4, %5 : vector<16x128xi32>
    %c-1_i32_1 = arith.constant -1 : i32
    %7 = vector.broadcast %c-1_i32_1 : i32 to vector<16x128xi32>
    %8 = arith.addi %1, %7 : vector<16x128xi32>
    %c128_i32 = arith.constant 128 : i32
    %9 = vector.broadcast %c128_i32 : i32 to vector<16x128xi32>
    %10 = arith.cmpi slt, %8, %9 : vector<16x128xi32>
    %11 = arith.andi %6, %10 : vector<16x128xi1>
    %cst = arith.constant 0.000000e+00 : f32
    %12 = vector.broadcast %cst : f32 to vector<16x128xf32>
    %13 = arith.select %11, %2, %12 : vector<16x128xi1>, vector<16x128xf32>
    %c127_i32 = arith.constant 127 : i32
    %14 = tpu.dynamic_rotate %0 by %c127_i32 dim 1 : vector<16x128xf32>, i32 -> vector<16x128xf32>
    %c1_i32_2 = arith.constant 1 : i32
    %15 = vector.broadcast %c1_i32_2 : i32 to vector<16x128xi32>
    %16 = arith.addi %1, %15 : vector<16x128xi32>
    %c0_i32_3 = arith.constant 0 : i32
    %17 = vector.broadcast %c0_i32_3 : i32 to vector<16x128xi32>
    %18 = arith.cmpi sge, %16, %17 : vector<16x128xi32>
    %c1_i32_4 = arith.constant 1 : i32
    %19 = vector.broadcast %c1_i32_4 : i32 to vector<16x128xi32>
    %20 = arith.addi %1, %19 : vector<16x128xi32>
    %c128_i32_5 = arith.constant 128 : i32
    %21 = vector.broadcast %c128_i32_5 : i32 to vector<16x128xi32>
    %22 = arith.cmpi slt, %20, %21 : vector<16x128xi32>
    %23 = arith.andi %18, %22 : vector<16x128xi1>
    %cst_6 = arith.constant 0.000000e+00 : f32
    %24 = vector.broadcast %cst_6 : f32 to vector<16x128xf32>
    %25 = arith.select %23, %14, %24 : vector<16x128xi1>, vector<16x128xf32>
    %26 = tpu.concatenate %13, %0, %25 in 0 : vector<16x128xf32>, vector<16x128xf32>, vector<16x128xf32> -> vector<48x128xf32>
    %c0_7 = arith.constant 0 : index
    %c0_8 = arith.constant 0 : index
    %27 = vector.load %arg2[%c0_7, %c0_8] : memref<32x48xf32, #tpu.memory_space<vmem>>, vector<32x48xf32>
    %cst_9 = arith.constant dense<0.000000e+00> : vector<32x128xf32>
    %28 = tpu.matmul %27, %26, %cst_9 {dimension_numbers = #tpu.dot_dimension_numbers<[1], [0], [0], [1], [0, 0, 1, 1], [], []>} : vector<32x48xf32>, vector<48x128xf32>, vector<32x128xf32> -> vector<32x128xf32>
    %c0_10 = arith.constant 0 : index
    %c0_11 = arith.constant 0 : index
    %29 = vector.load %arg3[%c0_10, %c0_11] : memref<64x1xf32, #tpu.memory_space<vmem>>, vector<64x1xf32>
    %30 = vector.extract_strided_slice %29 {offsets = [0, 0], sizes = [32, 1], strides = [1, 1]} : vector<64x1xf32> to vector<32x1xf32>
    %31 = vector.extract_strided_slice %29 {offsets = [32, 0], sizes = [32, 1], strides = [1, 1]} : vector<64x1xf32> to vector<32x1xf32>
    %cst_12 = arith.constant dense<0.000000e+00> : vector<32xf32>
    %32 = vector.multi_reduction <add>, %28, %cst_12 [1] : vector<32x128xf32> to vector<32xf32>
    %33 = vector.shape_cast %32 : vector<32xf32> to vector<32x1xf32>
    %cst_13 = arith.constant 1.280000e+02 : f32
    %34 = vector.broadcast %cst_13 : f32 to vector<32x1xf32>
    %35 = arith.divf %33, %34 : vector<32x1xf32>
    %36 = vector.broadcast %35 : vector<32x1xf32> to vector<32x128xf32>
    %37 = arith.subf %28, %36 : vector<32x128xf32>
    %38 = arith.mulf %37, %37 : vector<32x128xf32>
    %cst_14 = arith.constant dense<0.000000e+00> : vector<32xf32>
    %39 = vector.multi_reduction <add>, %38, %cst_14 [1] : vector<32x128xf32> to vector<32xf32>
    %40 = vector.shape_cast %39 : vector<32xf32> to vector<32x1xf32>
    %cst_15 = arith.constant 1.280000e+02 : f32
    %41 = vector.broadcast %cst_15 : f32 to vector<32x1xf32>
    %42 = arith.divf %40, %41 : vector<32x1xf32>
    %cst_16 = arith.constant 9.99999993E-9 : f32
    %43 = vector.broadcast %cst_16 : f32 to vector<32x1xf32>
    %44 = arith.addf %42, %43 : vector<32x1xf32>
    %45 = math.rsqrt %44 : vector<32x1xf32>
    %46 = arith.mulf %30, %45 : vector<32x1xf32>
    %47 = vector.broadcast %46 : vector<32x1xf32> to vector<32x128xf32>
    %48 = arith.mulf %37, %47 : vector<32x128xf32>
    %49 = vector.broadcast %31 : vector<32x1xf32> to vector<32x128xf32>
    %50 = arith.addf %48, %49 : vector<32x128xf32>
    %51 = vector.extract_strided_slice %50 {offsets = [0, 0], sizes = [16, 128], strides = [1, 1]} : vector<32x128xf32> to vector<16x128xf32>
    %52 = vector.extract_strided_slice %50 {offsets = [16, 0], sizes = [16, 128], strides = [1, 1]} : vector<32x128xf32> to vector<16x128xf32>
    %53 = arith.negf %52 : vector<16x128xf32>
    %54 = math.exp %53 : vector<16x128xf32>
    %cst_17 = arith.constant 1.000000e+00 : f32
    %55 = vector.broadcast %cst_17 : f32 to vector<16x128xf32>
    %56 = arith.addf %55, %54 : vector<16x128xf32>
    %57 = arith.divf %55, %56 : vector<16x128xf32>
    %58 = arith.mulf %51, %57 : vector<16x128xf32>
    %59 = arith.addf %0, %58 : vector<16x128xf32>
    %c0_18 = arith.constant 0 : index
    %c0_19 = arith.constant 0 : index
    %60 = vector.load %arg4[%c0_18, %c0_19] : memref<16x128xf32, #tpu.memory_space<vmem>>, vector<16x128xf32>
    tpu.vector_store %arg4[%c0_18, %c0_19], %59 {strides = array<i32>} : memref<16x128xf32, #tpu.memory_space<vmem>>, vector<16x128xf32>,
    return
  }
  func.func @transform_0(%arg0: i32) -> (i32, i32) {
    %c0_i32 = arith.constant 0 : i32
    %c0_i32_0 = arith.constant 0 : i32
    return %arg0, %c0_i32 : i32, i32
  }
  func.func @transform_1(%arg0: i32) -> (i32, i32) {
    %c0_i32 = arith.constant 0 : i32
    %c0_i32_0 = arith.constant 0 : i32
    %c0_i32_1 = arith.constant 0 : i32
    return %c0_i32, %c0_i32_0 : i32, i32
  }
  func.func @transform_2(%arg0: i32) -> (i32, i32) {
    %c0_i32 = arith.constant 0 : i32
    %c0_i32_0 = arith.constant 0 : i32
    return %arg0, %c0_i32 : i32, i32
  }
  func.func @transform_3(%arg0: i32) -> (i32, i32) {
    %c0_i32 = arith.constant 0 : i32
    %c0_i32_0 = arith.constant 0 : i32
    return %arg0, %c0_i32 : i32, i32
  }
}

</mosaic_0001>

<bundles_post_ra>
// kernel: tpu_custom_call.1
= control target key start
LH: loop header
LB: loop body
LE: loop exit
PB: predicated region body
PF: predicated region fallthrough
CT: control target
= control target key end

     0   :  { %s498_s0 = inlined_call_operand.vmem [shape: f32[16,128], index: 0, kind: input, shape index: {}]   ;;  %s499_s1 = inlined_call_operand.vmem [shape: f32[32,48], index: 1, kind: input, shape index: {}]   ;;  %s500_s2 = inlined_call_operand.vmem [shape: f32[64,1], index: 2, kind: input, shape index: {}]   ;;  %s501_s3 = inlined_call_operand.hbm [shape: f32[16,128], index: 3, kind: output, shape index: {}]  }
   0x1   :  { %v423_v0 = vld [vmem:[%s498_s0] sm:$0xff]  ;;  %v428_v1 = vld [vmem:[%s498_s0 + $0x8] sm:$0xff] }
   0x2   :  { %8 = vsyncpa [#allocation3], 0  ;;  %v342_v2 = vpack.i.bf16 %v428_v1, %v423_v0  ;;  %s394_s16 = smov 1   ;;  %v39_v3 = vld [vmem:[%s499_s1] sm:$0xff]  ;;  %vm43_vm0 = vcmask 392192   ;;  %v41_v4 = vld [vmem:[%s499_s1 + $0x10] sm:$0xff]  ;;  %v17_v5 = vlaneseq  ;;  %v320_v13 = vpack.c.bf16 %v428_v1, %v423_v0 }
   0x3   :  { %308 = vmatprep.mubr.msk.f32.mxu0 %vm43_vm0, %v39_v3  ;;  %311 = vmatprep.mubr.msk.f32.mxu1 %vm43_vm0, %v41_v4  ;;  %s395_s0 = smov 127   ;;  %v40_v18 = vld [vmem:[%s499_s1 + $0x8] sm:$0xff]  ;;  %v42_v19 = vld [vmem:[%s499_s1 + $0x18] sm:$0xff]  ;;  %v396_v40 = vmov 0   ;;  %v147_v41 = vld [vmem:[%s500_s2 + $0x30] sm:$0xff] }
   0x4   :  { %343 = vrot.lane.b32.xlu0 %v342_v2, %s394_s16  ;;  %v18_v6 = vand.u32 127, %v17_v5  ;;  %353 = vset.pattern.permute.xlu1 %v396_v40  ;;  %v143_v51 = vld [vmem:[%s500_s2 + $0x10] sm:$0xff]  ;;  %v144_v56 = vld [vmem:[%s500_s2 + $0x18] sm:$0xff]  ;;  %v142_v61 = vld [vmem:[%s500_s2 + $0x8] sm:$0xff] }
   0x5   :  { %352 = vset.pattern.permute.xlu0 %v396_v40  ;;  %v148_v59 = vld [vmem:[%s500_s2 + $0x38] sm:$0xff]  ;;  %v141_v4 = vld [vmem:[%s500_s2] sm:$0xff] }
   0x6   :  { %v23_v7 = vadd.s32 4294967295, %v18_v6  ;;  %v33_v11 = vadd.s32 1, %v18_v6  ;;  %v146_v6 = vld [vmem:[%s500_s2 + $0x28] sm:$0xff] }
   0x8   :  { %348 = vrot.lane.b32.xlu0 %v342_v2, %s395_s0  ;;  %vm24_vm1 = vcmp.ge.s32.totalorder %v23_v7, 0  ;;  %vm35_vm3 = vcmp.lt.s32.totalorder %v33_v11, 128  ;;  %v145_v2 = vld [vmem:[%s500_s2 + $0x20] sm:$0xff]  ;;  %s397_s2 = smov [#allocation2]  }
   0x9   :  { %vm315_vm2 = vmpackc.low %vm24_vm1, %vm24_vm1  ;;  %s265_s13 = sshll.u32 %s397_s2, 4  ;;  %s266_s13 = int_to_ptr.vmem [resolvable:$true] %s265_s13 }
   0xa   :  { %vm325_vm4 = vmpackc.low %vm35_vm3, %vm35_vm3  ;;  %s370_s14 = scalar_lea.vmem %s266_s13, 256  ;;  %p375_p1 = scmp.lt.s32.totalorder %s266_s13, %s266_s13 }
   0xb   :  { %p371_p0 = scmp.ne.s32.totalorder %s266_s13, %s370_s14  ;;  %p376_p2 = scmp.lt.s32.totalorder %s370_s14, %s370_s14 }
   0xd   :  { %p377_p3 = por %p376_p2, %p375_p1 }
   0xf   :  { %p378_p4 = pnand %p377_p3, %p371_p0 }
  0x76   :  { %v344_v8 = vpop.permute.xlu0 %343 }
  0x77   :  { %v346_v9 = vunpack.i.h.bf16 %v344_v8  ;;  %v345_v10 = vunpack.i.l.bf16 %v344_v8 }
  0x79   :  { %v314_v12 = vpack.c.bf16 %v346_v9, %v345_v10 }
  0x7a   :  { %v349_v14 = vpop.permute.xlu0 %348 }
  0x7b   :  { %316 = vmatprep.subr.msk.bf16.mxu0 %vm315_vm2, %v314_v12  ;;  %330 = vmatprep.subr.msk.bf16.mxu1 %vm315_vm2, %v314_v12  ;;  %v351_v15 = vunpack.i.h.bf16 %v349_v14  ;;  %v350_v16 = vunpack.i.l.bf16 %v349_v14 }
  0x7c   :  { %319 = vmatpush3.bf16.msk.msra.mxu0 %vm315_vm2, %v314_v12  ;;  %333 = vmatpush3.bf16.msk.msra.mxu1 %vm315_vm2, %v314_v12 }
  0x7d   :  { %v324_v17 = vpack.c.bf16 %v351_v15, %v350_v16  ;;  %321 = vmatprep.subr.bf16.mxu0 %v320_v13  ;;  %331 = vmatprep.subr.bf16.mxu1 %v320_v13 }
  0x80   :  { %323 = vmatpush3.bf16.msra.mxu0 %v320_v13  ;;  %334 = vmatpush3.bf16.msra.mxu1 %v320_v13 }
  0x81   :  { %326 = vmatprep.subr.msk.bf16.mxu0 %vm325_vm4, %v324_v17  ;;  %332 = vmatprep.subr.msk.bf16.mxu1 %vm325_vm4, %v324_v17 }
  0x84   :  { %329 = vmatpush3.bf16.msk.msra.mxu0 %vm325_vm4, %v324_v17  ;;  %335 = vmatpush3.bf16.msk.msra.mxu1 %vm325_vm4, %v324_v17 }
  0x87   :  { %309 = vmatmul.mubr.msk.f32.vlgmr.msra.gmra.mrb[0].mxu0 %vm43_vm0, %v40_v18  ;;  %312 = vmatmul.mubr.msk.f32.vlgmr.msra.gmra.mrb[0].mxu1 %vm43_vm0, %v42_v19 }
 0x15a   :  { %v310_v20 = vpop.f32.mrb[0].mxu0  ;;  %v313_v21 = vpop.f32.mrb[0].mxu1 }
 0x15b   :  { %v122_v22 = vpop.f32.mrb[1].mxu0  ;;  %v132_v23 = vpop.f32.mrb[1].mxu1 }
 0x15c   :  { %153 = vadd.xlane.f32.xlu1 %v132_v23  ;;  %149 = vadd.xlane.f32.xlu0 %v122_v22 }
 0x160   :  { %155 = vadd.xlane.f32.xlu1 %v313_v21 }
 0x164   :  { %151 = vadd.xlane.f32.xlu1 %v310_v20 }
 0x1e9   :  { %v154_v24 = vpop.xlane.xlu1 %153  ;;  %v150_v26 = vpop.xlane.xlu0 %149 }
 0x1ea   :  { %v160_v25 = vmul.f32 0.0078125, %v154_v24  ;;  %v158_v29 = vmul.f32 0.0078125, %v150_v26 }
 0x1ec   :  { %v164_v27 = vsub.f32 %v132_v23, %v160_v25  ;;  %v450_v34 = vsub.f32 %v122_v22, %v158_v29 }
 0x1ed   :  { %v156_v28 = vpop.xlane.xlu1 %155 }
 0x1ee   :  { %v161_v30 = vmul.f32 0.0078125, %v156_v28  ;;  %v168_v31 = vmul.f32 %v164_v27, %v164_v27  ;;  %v166_v38 = vmul.f32 %v450_v34, %v450_v34 }
 0x1f0   :  { %v165_v32 = vsub.f32 %v313_v21, %v161_v30  ;;  %174 = vadd.xlane.f32.xlu1 %v168_v31 }
 0x1f1   :  { %v152_v33 = vpop.xlane.xlu1 %151 }
 0x1f2   :  { %v159_v35 = vmul.f32 0.0078125, %v152_v33  ;;  %v169_v36 = vmul.f32 %v165_v32, %v165_v32 }
 0x1f4   :  { %176 = vadd.xlane.f32.xlu1 %v169_v36  ;;  %v452_v37 = vsub.f32 %v310_v20, %v159_v35 }
 0x1f6   :  { %v167_v39 = vmul.f32 %v452_v37, %v452_v37 }
 0x1f8   :  { %170 = vadd.xlane.f32.xlu1 %v166_v38 }
 0x1fc   :  { %172 = vadd.xlane.f32.xlu1 %v167_v39 }
 0x20d   :  { %230 = vperm.xlu1 %353, %v147_v41  }
 0x27d   :  { %v175_v42 = vpop.xlane.xlu1 %174 }
 0x27e   :  { %v180_v43 = vmul.f32 0.0078125, %v175_v42 }
 0x280   :  { %v184_v44 = vadd.f32 1e-08, %v180_v43 }
 0x281   :  { %v177_v45 = vpop.xlane.xlu1 %176 }
 0x282   :  { %354 = vrsqrt.f32 %v184_v44  ;;  %v181_v46 = vmul.f32 0.0078125, %v177_v45 }
 0x284   :  { %v185_v47 = vadd.f32 1e-08, %v181_v46 }
 0x285   :  { %v171_v48 = vpop.xlane.xlu1 %170 }
 0x286   :  { %356 = vrsqrt.f32 %v185_v47  ;;  %v178_v53 = vmul.f32 0.0078125, %v171_v48 }
 0x288   :  { %v182_v58 = vadd.f32 1e-08, %v178_v53 }
 0x289   :  { %v173_v49 = vpop.xlane.xlu1 %172 }
 0x28a   :  { %v179_v50 = vmul.f32 0.0078125, %v173_v49 }
 0x28c   :  { %v355_v52 = vpop.eup %354  ;;  %v183_v54 = vadd.f32 1e-08, %v179_v50 }
 0x28d   :  { %v192_v55 = vmul.f32 %v355_v52, %v143_v51  ;;  %v231_v7 = vpop.permute.xlu1 %230 }
 0x28e   :  { %358 = vrsqrt.f32 %v183_v54 }
 0x28f   :  { %206 = vperm.xlu1 %353, %v192_v55   ;;  %360 = vrsqrt.f32 %v182_v58 }
 0x290   :  { %v357_v57 = vpop.eup %356 }
 0x291   :  { %v193_v60 = vmul.f32 %v357_v57, %v144_v56 }
 0x293   :  { %211 = vperm.xlu0 %352, %v193_v60   ;;  %235 = vperm.xlu1 %353, %v148_v59  }
 0x298   :  { %v359_v62 = vpop.eup %358 }
 0x299   :  { %v191_v63 = vmul.f32 %v359_v62, %v142_v61  ;;  %v361_v3 = vpop.eup %360 }
 0x29a   :  { %v190_v5 = vmul.f32 %v361_v3, %v141_v4 }
 0x29b   :  { %201 = vperm.xlu1 %353, %v191_v63  }
 0x29f   :  { %220 = vperm.xlu1 %353, %v145_v2  }
 0x2a3   :  { %196 = vperm.xlu1 %353, %v190_v5  }
 0x2a7   :  { %225 = vperm.xlu1 %353, %v146_v6  }
 0x30e   :  { %v207_v8 = vpop.permute.xlu1 %206 }
 0x30f   :  { %v216_v9 = vmul.f32 %v207_v8, %v164_v27 }
 0x311   :  { %v240_v10 = vadd.f32 %v231_v7, %v216_v9 }
 0x312   :  { %v212_v11 = vpop.permute.xlu0 %211  ;;  %v236_v14 = vpop.permute.xlu1 %235 }
 0x313   :  { %v284_v12 = vmul.f32 -1.442695, %v240_v10  ;;  %v217_v13 = vmul.f32 %v212_v11, %v165_v32 }
 0x315   :  { %362 = vpow2.f32 %v284_v12  ;;  %v241_v15 = vadd.f32 %v236_v14, %v217_v13 }
 0x317   :  { %v285_v16 = vmul.f32 -1.442695, %v241_v15 }
 0x319   :  { %364 = vpow2.f32 %v285_v16 }
 0x31a   :  { %v202_v17 = vpop.permute.xlu1 %201 }
 0x31b   :  { %v215_v28 = vmul.f32 %v202_v17, %v452_v37 }
 0x31e   :  { %v221_v18 = vpop.permute.xlu1 %220 }
 0x31f   :  { %v363_v19 = vpop.eup %362 }
 0x320   :  { %v248_v20 = vadd.f32 1.0, %v363_v19 }
 0x322   :  { %366 = vrcp.f32 %v248_v20  ;;  %v197_v23 = vpop.permute.xlu1 %196 }
 0x323   :  { %v365_v21 = vpop.eup %364  ;;  %v214_v24 = vmul.f32 %v197_v23, %v450_v34 }
 0x324   :  { %v249_v22 = vadd.f32 1.0, %v365_v21 }
 0x325   :  { %v238_v25 = vadd.f32 %v221_v18, %v214_v24 }
 0x326   :  { %368 = vrcp.f32 %v249_v22  ;;  %v226_v27 = vpop.permute.xlu1 %225 }
 0x327   :  { %v239_v31 = vadd.f32 %v226_v27, %v215_v28 }
 0x32c   :  { %v367_v26 = vpop.eup %366 }
 0x32d   :  { %v254_v29 = vmul.f32 %v367_v26, %v238_v25 }
 0x32f   :  { %v256_v30 = vadd.f32 %v254_v29, %v423_v0 }
 0x330   :  { %v369_v32 = vpop.eup %368 }
 0x331   :  { %258 = vst [vmem:[#allocation2] sm:$0xff] %v256_v30  ;;  %v255_v33 = vmul.f32 %v369_v32, %v239_v31 }
 0x333   :  { %v257_v35 = vadd.f32 %v255_v33, %v428_v1 }
 0x335   :  { %259 = vst [vmem:[#allocation2 + $0x8] sm:$0xff] %v257_v35 }
 0x336   :  { %381 = shalt.err (!%p378_p4)
}
 0x337   :  { %s382_s17 = scalar_lea.hbm %s501_s3, 256 }
 0x338   :  { %p383_p5 = scmp.ne.s32.totalorder %s501_s3, %s382_s17  ;;  %p386_p6 = scmp.lt.u32.totalorder %s382_s17, %s501_s3 }
 0x33a   :  { %p388_p7 = pnand %p386_p6, %p383_p5 }
 0x33c   :  { %391 = shalt.err (!%p388_p7)
}
 0x33d   :  { %s398_s21 = smov 128   ;;  %s399_s22 = smov 8  }
 0x33e   :  { %271 = dma.vmem_to_hbm [thread:$0]  %s266_s13, 256, %s501_s3, [#allocation3], %s398_s21, %s398_s21, %s399_s22  }
 0x33f   :  { %392 = dma.done.wait [#allocation3], 256  }
 0x340   :  { %393 = vsyncadd [#allocation3], 4294967040 }
 0x341   :  { %275 = vsyncpa [#allocation3], 1 }

</bundles_post_ra>
